<compile_context>
chip_gen: v6e
topology: v6e:2x2x1
jax: 0.10.0
libtpu: 0.0.40
codegen_flags: <defaults>
</compile_context>

<pallas_src>
import functools

import jax
import jax.numpy as jnp
from jax import lax
from jax.experimental import pallas as pl
from jax.experimental.pallas import tpu as pltpu


def _round_up(v, m):
    return (v + m - 1) // m * m


def _round_down_pos(v, m):
    return max(m, (v // m) * m)


# ----------------------------- kernels ---------------------------------------


def _lr_kernel_full_d(x_ref, w_ref, b_ref, o_ref):
    """Full feature dim resident.

    x_ref: (TM, D) f32 VMEM, w_ref: (1, D) f32 VMEM, b_ref: (1,) f32 SMEM,
    o_ref: (1, TM) f32 VMEM (batch along lanes -> dense stores).
    """
    y = lax.dot_general(
        w_ref[...], x_ref[...],
        dimension_numbers=(((1,), (1,)), ((), ())),   # contract D of both
        preferred_element_type=jnp.float32,
        precision=lax.Precision.HIGHEST,
    )
    o_ref[...] = y + b_ref[0]                          # scalar bias add on VPU


def _lr_kernel_d_tiled(x_ref, w_ref, b_ref, o_ref, acc_ref, *, d_total, tk):
    """Feature-tiled reduction path for large D.

    Grid is (N/tm, D/tk) with the reduction axis last; acc_ref is a (1, TM)
    f32 VMEM accumulator resident across the k axis.
    """
    k = pl.program_id(1)

    @pl.when(k == 0)
    def _():
        acc_ref[...] = jnp.zeros_like(acc_ref)

    w = w_ref[...]
    x = x_ref[...]
    if d_total % tk != 0:
        # Ragged last feature block: zero OOB columns of both operands so
        # uninitialized VMEM (possibly NaN/Inf bit patterns) cannot leak into
        # the accumulation.  OOB *rows* of x only affect OOB output lanes,
        # which are masked on store, so they need no handling.
        col_w = lax.broadcasted_iota(jnp.int32, w.shape, 1) + k * tk
        col_x = lax.broadcasted_iota(jnp.int32, x.shape, 1) + k * tk
        w = jnp.where(col_w < d_total, w, 0.0)
        x = jnp.where(col_x < d_total, x, 0.0)

    acc_ref[...] += lax.dot_general(
        w, x,
        dimension_numbers=(((1,), (1,)), ((), ())),
        preferred_element_type=jnp.float32,
        precision=lax.Precision.HIGHEST,
    )

    @pl.when(k == pl.num_programs(1) - 1)
    def _():
        o_ref[...] = acc_ref[...] + b_ref[0]


# ----------------------------- wrapper ----------------------------------------

_TARGET_TILE_BYTES = 4 << 20   # aim for ~4 MiB x tile per pipeline buffer
_MAX_TILE_BYTES = 8 << 20      # 2x double-buffer stays well inside v7x VMEM


@functools.partial(jax.jit, static_argnames=("block_rows", "block_cols"))
def torch_lr_forward(x, weight, bias, *, block_rows=None, block_cols=None):
    """JAX/Pallas equivalent of torch_lr.forward.

    x:      (N, D) float32
    weight: (1, D) float32   (torch.nn.Linear(D, 1).weight shape)
    bias:   (1,)   float32   (torch.nn.Linear(D, 1).bias shape)
    returns (N, 1) float32

    block_rows / block_cols are optional tile-size overrides (testing / tuning).
    """
    N, D = x.shape
    x = x.astype(jnp.float32)
    w = weight.reshape(1, D).astype(jnp.float32)
    b = bias.reshape(1).astype(jnp.float32)

    row_bytes = 4 * D

    # ---- pick the batch tile (tm); all Python ints, static under jit --------
    if block_rows is not None:
        tm = int(block_rows)
    elif N <= 128:
        tm = N                        # single full-extent block
    else:
        tm = max(128, _round_down_pos(_TARGET_TILE_BYTES // row_bytes, 128))
        # Keep >= ~4 grid steps when N allows, so the "parallel" batch axis
        # actually spreads work across both TensorCores on v7x.
        tm = min(tm, max(128, _round_up(pl.cdiv(N, 4), 128)))

    # ---- decide whether D must be tiled (reduction grid axis) ---------------
    if block_cols is not None:
        use_d_tiling = int(block_cols) < D
    else:
        use_d_tiling = tm * row_bytes > _MAX_TILE_BYTES

    grid_n = pl.cdiv(N, tm)

    if not use_d_tiling:
        # Full feature dim resident per block.
        kernel = _lr_kernel_full_d
        grid = (grid_n,)
        in_specs = [
            pl.BlockSpec((tm, D), lambda i: (i, 0)),       # x tile
            pl.BlockSpec((1, D), lambda i: (0, 0)),        # weight (constant)
            pl.BlockSpec(memory_space=pltpu.MemorySpace.SMEM),  # bias scalar
        ]
        out_specs = pl.BlockSpec((1, tm), lambda i: (0, i))
        scratch_shapes = []
        dim_sem = ("parallel",)
        x_tile_bytes = tm * D * 4
        w_tile_bytes = 8 * _round_up(D, 128) * 4
    else:
        if block_cols is not None:
            tk = int(block_cols)
        else:
            tk = max(128, _round_down_pos(_TARGET_TILE_BYTES // (4 * tm), 128))
            tk = min(tk, _round_up(D, 128))
        grid_k = pl.cdiv(D, tk)
        kernel = functools.partial(_lr_kernel_d_tiled, d_total=D, tk=tk)
        grid = (grid_n, grid_k)
        in_specs = [
            pl.BlockSpec((tm, tk), lambda i, k: (i, k)),   # x tile
            pl.BlockSpec((1, tk), lambda i, k: (0, k)),    # weight tile
            pl.BlockSpec(memory_space=pltpu.MemorySpace.SMEM),
        ]
        out_specs = pl.BlockSpec((1, tm), lambda i, k: (0, i))
        scratch_shapes = [pltpu.VMEM((1, tm), jnp.float32)]
        dim_sem = ("parallel", "arbitrary")
        x_tile_bytes = tm * tk * 4
        w_tile_bytes = 8 * tk * 4

    # Explicit scoped-VMEM budget: double-buffered x + weight + output blocks
    # plus slack.  Tiles are capped at 8 MiB so this stays <= ~24 MiB and is
    # safe on every generation (v5e default scoped limit is only 16 MiB).
    out_tile_bytes = 8 * _round_up(tm, 128) * 4
    vmem_limit = 2 * x_tile_bytes + 2 * w_tile_bytes + 2 * out_tile_bytes + (4 << 20)
    vmem_limit = int(min(max(vmem_limit, 16 << 20), 48 << 20))

    y_row = pl.pallas_call(
        kernel,
        out_shape=jax.ShapeDtypeStruct((1, N), jnp.float32),
        grid_spec=pltpu.PrefetchScalarGridSpec(
            num_scalar_prefetch=0,
            grid=grid,
            in_specs=in_specs,
            out_specs=out_specs,
            scratch_shapes=scratch_shapes,
        ),
        compiler_params=pltpu.CompilerParams(
            dimension_semantics=dim_sem,
            vmem_limit_bytes=vmem_limit,
        ),
        cost_estimate=pl.CostEstimate(
            flops=2 * N * D,
            transcendentals=0,
            bytes_accessed=4 * (N * D + D + 1 + N),
        ),
    )(x, w, b)

    # Layout plumbing only: (1, N) lane-dense result -> (N, 1).
    return y_row.reshape(N, 1)


if __name__ == "__main__":
    key = jax.random.PRNGKey(0)
    kx, kw, kb, kx2, kx3, kw3 = jax.random.split(key, 6)

    # Small shapes consistent with a linear-regression dataset: N samples,
    # D features, torch.nn.Linear(D, 1) parameters.
    N, D = 8, 32
    x = jax.random.normal(kx, (N, D), dtype=jnp.float32)
    bound = 1.0 / jnp.sqrt(jnp.float32(D))
    weight = jax.random.uniform(kw, (1, D), minval=-bound, maxval=bound,
                                dtype=jnp.float32)
    bias = jax.random.uniform(kb, (1,), minval=-bound, maxval=bound,
                              dtype=jnp.float32)

    # 1) Tiny single-block path (full-extent blocks, grid of 1).
    y_hat = torch_lr_forward(x, weight, bias)
    jax.block_until_ready(y_hat)
    y_ref = x @ weight.T + bias
    assert y_hat.shape == (N, 1)
    assert jnp.allclose(y_hat, y_ref, atol=1e-4, rtol=1e-5)

    # 2) Batch-tiled path: ragged last block handled by Pallas (no jnp.pad),
    #    3 "parallel" grid steps so both v7x TensorCores are fed.
    N2 = 300
    x2 = jax.random.normal(kx2, (N2, D), dtype=jnp.float32)
    y_hat2 = torch_lr_forward(x2, weight, bias)
    jax.block_until_ready(y_hat2)
    y_ref2 = x2 @ weight.T + bias
    assert y_hat2.shape == (N2, 1)
    assert jnp.allclose(y_hat2, y_ref2, atol=1e-4, rtol=1e-5)

    # 3) Feature-tiled (reduction-grid) path, forced at small shapes to
    #    exercise the accumulator + ragged-D masking used for large D.
    N3, D3 = 300, 320
    x3 = jax.random.normal(kx3, (N3, D3), dtype=jnp.float32)
    weight3 = jax.random.uniform(kw3, (1, D3), minval=-bound, maxval=bound,
                                 dtype=jnp.float32)
    y_hat3 = torch_lr_forward(x3, weight3, bias, block_rows=128, block_cols=128)
    jax.block_until_ready(y_hat3)
    y_ref3 = x3 @ weight3.T + bias
    assert y_hat3.shape == (N3, 1)
    assert jnp.allclose(y_hat3, y_ref3, atol=1e-4, rtol=1e-5)

    # TODO(synk): training utilities of torch_lr (SGD step, MSE loss tracking,
    # matplotlib plotting) are host-side and intentionally not kernelized.
    print("KERNEL_OK")
</pallas_src>

<mosaic_0001>
module attributes {stable_mosaic.version = 11 : i64} {
  func.func @_lr_kernel_full_d(%arg0: i32, %arg1: memref<8x32xf32, #tpu.memory_space<vmem>>, %arg2: memref<1x32xf32, #tpu.memory_space<vmem>>, %arg3: memref<1xf32, #tpu.memory_space<smem>>, %arg4: memref<1x8xf32, #tpu.memory_space<vmem>>) attributes {dimension_semantics = [#tpu.dimension_semantics<parallel>], iteration_bounds = array<i64: 1>, scalar_prefetch = 0 : i64, scratch_operands = 0 : i64, tpu.core_type = #tpu.core_type<tc>, window_params = [{transform_indices = @transform_0, window_bounds = array<i64: 8, 32>}, {pipeline_mode = #tpu.pipeline_mode<synchronous>, transform_indices = @transform_1, window_bounds = array<i64: 1, 32>}, {transform_indices = @transform_2, window_bounds = array<i64: 1>}, {transform_indices = @transform_3, window_bounds = array<i64: 1, 8>}]} {
    %c0 = arith.constant 0 : index
    %c0_0 = arith.constant 0 : index
    %0 = vector.load %arg2[%c0, %c0_0] : memref<1x32xf32, #tpu.memory_space<vmem>>, vector<1x32xf32>
    %c0_1 = arith.constant 0 : index
    %c0_2 = arith.constant 0 : index
    %1 = vector.load %arg1[%c0_1, %c0_2] : memref<8x32xf32, #tpu.memory_space<vmem>>, vector<8x32xf32>
    %cst = arith.constant dense<0.000000e+00> : vector<1x8xf32>
    %2 = tpu.matmul %0, %1, %cst {dimension_numbers = #tpu.dot_dimension_numbers<[1], [1], [0], [0], [0, 0, 1, 0], [], []>, precision = #tpu.contract_precision<fp32>} : vector<1x32xf32>, vector<8x32xf32>, vector<1x8xf32> -> vector<1x8xf32>
    %c0_3 = arith.constant 0 : index
    %3 = memref.load %arg3[%c0_3] : memref<1xf32, #tpu.memory_space<smem>>
    %4 = vector.broadcast %3 : f32 to vector<1x8xf32>
    %5 = arith.addf %2, %4 : vector<1x8xf32>
    %c0_4 = arith.constant 0 : index
    %c0_5 = arith.constant 0 : index
    %6 = vector.load %arg4[%c0_4, %c0_5] : memref<1x8xf32, #tpu.memory_space<vmem>>, vector<1x8xf32>
    tpu.vector_store %arg4[%c0_4, %c0_5], %5 {strides = array<i32>} : memref<1x8xf32, #tpu.memory_space<vmem>>, vector<1x8xf32>,
    return
  }
  func.func @transform_0(%arg0: i32) -> (i32, i32) {
    %c0_i32 = arith.constant 0 : i32
    %c0_i32_0 = arith.constant 0 : i32
    return %arg0, %c0_i32 : i32, i32
  }
  func.func @transform_1(%arg0: i32) -> (i32, i32) {
    %c0_i32 = arith.constant 0 : i32
    %c0_i32_0 = arith.constant 0 : i32
    %c0_i32_1 = arith.constant 0 : i32
    return %c0_i32, %c0_i32_0 : i32, i32
  }
  func.func @transform_2(%arg0: i32) -> i32 {
    %c0_i32 = arith.constant 0 : i32
    %c0_i32_0 = arith.constant 0 : i32
    return %c0_i32 : i32
  }
  func.func @transform_3(%arg0: i32) -> (i32, i32) {
    %c0_i32 = arith.constant 0 : i32
    %c0_i32_0 = arith.constant 0 : i32
    return %c0_i32, %arg0 : i32, i32
  }
}

</mosaic_0001>

<bundles_post_ra>
// kernel: torch_lr_forward.1
= control target key start
LH: loop header
LB: loop body
LE: loop exit
PB: predicated region body
PF: predicated region fallthrough
CT: control target
= control target key end

     0   :  { %9 = vsyncpa [#allocation4], 0  ;;  %s634_s0 = inlined_call_operand.hbm [shape: f32[8,32], index: 0, kind: input, shape index: {}]   ;;  %s635_s1 = inlined_call_operand.vmem [shape: f32[1,32], index: 1, kind: input, shape index: {}]   ;;  %s636_s2 = inlined_call_operand.<no memory space> [shape: f32[1], index: 2, kind: input, shape index: {}]   ;;  %s637_s3 = inlined_call_operand.hbm [shape: f32[1,8], index: 3, kind: output, shape index: {}]  }
   0x1   :  { %10 = vsyncpa [#allocation5], 0  ;;  %s592_s12 = smov [#allocation3]  }
   0x2   :  { %s17_s13 = sshll.u32 %s592_s12, 4  ;;  %s18_s13 = int_to_ptr.vmem [resolvable:$true] %s17_s13 }
   0x3   :  { %s556_s14 = scalar_lea.vmem %s18_s13, 128  ;;  %p561_p1 = scmp.lt.s32.totalorder %s18_s13, %s18_s13 }
   0x4   :  { %p557_p0 = scmp.ne.s32.totalorder %s18_s13, %s556_s14  ;;  %p562_p2 = scmp.lt.s32.totalorder %s556_s14, %s556_s14 }
   0x6   :  { %p563_p3 = por %p562_p2, %p561_p1 }
   0x8   :  { %p564_p4 = pnand %p563_p3, %p557_p0 }
   0xa   :  { %567 = shalt.err (!%p564_p4)
}
   0xb   :  { %20 = dma.hbm_to_vmem [thread:$0]  %s634_s0, 128, %s18_s13, [#allocation4]  }
   0xc   :  { %588 = dma.done.wait [#allocation4], 128  }
   0xd   :  { %589 = vsyncadd [#allocation4], 4294967168  ;;  %v593_v0 = vmov 0.0   ;;  %vm594_vm0 = vmmov 0   ;;  %vm32_vm1 = vcmask 261120   ;;  %v29_v1 = vld [vmem:[#allocation3] sm:$0xff]  ;;  %v31_v15 = vstv %s636_s2 }
   0xe   :  { %514 = vmatprep.subr.mxu0 %v593_v0  ;;  %516 = vmatprep.mubr.msk.f32.mxu0 %vm594_vm0, %v593_v0  ;;  %v28_v2 = vld [vmem:[%s635_s1] sm:$0x1]  ;;  %v37_v3 = vsel %vm32_vm1, %v29_v1, 0  ;;  %s595_s19 = smov [#allocation6]   ;;  %vm485_vm2 = vcmask 57344  }
   0xf   :  { %519 = vmatprep.subr.mxu1 %v593_v0  ;;  %521 = vmatprep.mubr.msk.f32.mxu1 %vm594_vm0, %v593_v0  ;;  %v34_v4 = vsel %vm32_vm1, %v28_v2, 0  ;;  %v70_v5 = vand.u32 4294901760, %v37_v3  ;;  %s493_s20 = sshll.u32 %s595_s19, 4  ;;  %s494_s20 = int_to_ptr.vmem [resolvable:$true] %s493_s20 }
  0x10   :  { %v105_v6 = vand.u32 4294901760, %v34_v4  ;;  %s568_s2 = scalar_lea.vmem %s494_s20, 16  ;;  %s572_s21 = scalar_lea.vmem %s494_s20, 32 }
  0x11   :  { %515 = vmatpush3.xpose.msra.mxu0 %v70_v5  ;;  %v147_v8 = vsub.f32 %v37_v3, %v70_v5  ;;  %p569_p5 = scmp.ne.s32.totalorder %s494_s20, %s568_s2  ;;  %p573_p6 = scmp.lt.s32.totalorder %s494_s20, %s494_s20 }
  0x12   :  { %v106_v7 = vsub.f32 %v34_v4, %v105_v6  ;;  %524 = vmatprep.subr.mxu0 %v593_v0  ;;  %p574_p7 = scmp.lt.s32.totalorder %s572_s21, %s568_s2 }
  0x13   :  { %v148_v10 = vand.u32 4294901760, %v147_v8 }
  0x14   :  { %v107_v9 = vand.u32 4294901760, %v106_v7  ;;  %p575_p8 = por %p574_p7, %p573_p6 }
  0x15   :  { %v149_v12 = vsub.f32 %v147_v8, %v148_v10 }
  0x16   :  { %v108_v11 = vsub.f32 %v106_v7, %v107_v9  ;;  %p576_p9 = pnand %p575_p8, %p569_p5 }
  0x17   :  { %v150_v14 = vand.u32 4294901760, %v149_v12 }
  0x18   :  { %v109_v13 = vand.u32 4294901760, %v108_v11 }
  0x19   :  { %520 = vmatpush3.xpose.msra.mxu1 %v150_v14 }
  0x1a   :  { %517 = vmatmul.mubr.f32.vlgmr.msra.gmra.mxu0 %v109_v13  ;;  %529 = vmatprep.subr.mxu1 %v593_v0 }
  0x1b   :  { %525 = vmatpush3.xpose.msra.mxu0 %v147_v8  ;;  %526 = vmatprep.mubr.msk.f32.mxu0 %vm594_vm0, %v593_v0 }
  0x1c   :  { %534 = vmatprep.subr.mxu0 %v593_v0  ;;  %522 = vmatmul.mubr.f32.vlgmr.msra.gmra.mxu1 %v105_v6 }
  0x1d   :  { %530 = vmatpush3.xpose.msra.mxu1 %v70_v5  ;;  %531 = vmatprep.mubr.msk.f32.mxu1 %vm594_vm0, %v593_v0 }
  0x1e   :  { %527 = vmatmul.mubr.f32.vlgmr.msra.gmra.mxu0 %v106_v7  ;;  %539 = vmatprep.subr.mxu1 %v593_v0 }
  0x1f   :  { %535 = vmatpush3.xpose.msra.mxu0 %v148_v10  ;;  %536 = vmatprep.mubr.msk.f32.mxu0 %vm594_vm0, %v593_v0 }
  0x20   :  { %532 = vmatmul.mubr.f32.vlgmr.msra.gmra.mxu1 %v107_v9 }
  0x21   :  { %540 = vmatpush3.xpose.msra.mxu1 %v70_v5  ;;  %541 = vmatprep.mubr.msk.f32.mxu1 %vm594_vm0, %v593_v0 }
  0x22   :  { %537 = vmatmul.mubr.f32.vlgmr.msra.gmra.mxu0 %v105_v6 }
  0x24   :  { %542 = vmatmul.mubr.f32.vlgmr.msra.gmra.mxu1 %v105_v6 }
  0xda   :  { %v111_v16 = vpop.f32.mrf.mxu0 }
  0xdb   :  { %v112_v17 = vadd.f32 %v111_v16, %v31_v15 }
  0xdc   :  { %v518_v18 = vpop.f32.mrf.mxu0  ;;  %v187_v19 = vpop.f32.mrf.mxu1 }
  0xdd   :  { %v188_v20 = vadd.f32 %v187_v19, %v112_v17 }
  0xde   :  { %v261_v21 = vpop.f32.mrf.mxu0  ;;  %v523_v22 = vpop.f32.mrf.mxu1 }
  0xdf   :  { %v262_v23 = vadd.f32 %v261_v21, %v188_v20 }
  0xe0   :  { %v528_v24 = vpop.f32.mrf.mxu0  ;;  %v335_v25 = vpop.f32.mrf.mxu1 }
  0xe1   :  { %v336_v26 = vadd.f32 %v335_v25, %v262_v23 }
  0xe2   :  { %v409_v27 = vpop.f32.mrf.mxu0  ;;  %v533_v28 = vpop.f32.mrf.mxu1 }
  0xe3   :  { %v410_v29 = vadd.f32 %v409_v27, %v336_v26 }
  0xe4   :  { %v538_v30 = vpop.f32.mrf.mxu0  ;;  %v481_v31 = vpop.f32.mrf.mxu1 }
  0xe5   :  { %v482_v32 = vadd.f32 %v481_v31, %v410_v29 }
  0xe6   :  { %v543_v33 = vpop.f32.mrf.mxu1 }
  0xe7   :  { %486 = vst.msk [vmem:[#allocation6] sm:$0x1] %vm485_vm2, %v482_v32 }
  0xe8   :  { %579 = shalt.err (!%p576_p9)
}
  0xe9   :  { %496 = dma.vmem_to_hbm [thread:$0]  %s494_s20, 16, %s637_s3, [#allocation5]  }
  0xea   :  { %590 = dma.done.wait [#allocation5], 16  }
  0xeb   :  { %591 = vsyncadd [#allocation5], 4294967280 }
  0xec   :  { %500 = vsyncpa [#allocation4], 1 }
  0xed   :  { %501 = vsyncpa [#allocation5], 1 }

</bundles_post_ra>
